<compile_context>
chip_gen: v6e
topology: v6e:2x2x1
jax: 0.10.0
libtpu: 0.0.40
codegen_flags: <defaults>
</compile_context>

<pallas_src>
import jax
import jax.numpy as jnp
from jax.experimental import pallas as pl
from jax.experimental.pallas import tpu as pltpu


def gcn_kernel(cols_ref, counts_ref, adj_ref, x_ref, w_ref, b_ref, o_ref, acc_ref):
    i = pl.program_id(0)          # row-tile index
    k = pl.program_id(1)          # position in this row-tile's nonzero-block list

    @pl.when(k == 0)
    def _init():
        acc_ref[...] = jnp.zeros_like(acc_ref)

    # Aggregation step: only for real (nonzero) column blocks of this row tile.
    # (tm, tk) bf16 @ (tk, F_in) bf16 -> f32 accumulate.
    @pl.when(k < counts_ref[i])
    def _accumulate():
        acc_ref[...] += jnp.dot(
            adj_ref[...], x_ref[...], preferred_element_type=jnp.float32
        )

    # Finalize: feature transform + bias on the accumulated (tm, F_in) tile.
    @pl.when(k == pl.num_programs(1) - 1)
    def _finalize():
        o_ref[...] = (
            jnp.dot(acc_ref[...], w_ref[...], preferred_element_type=jnp.float32)
            + b_ref[...]
        ).astype(o_ref.dtype)


def gcn_forward(adj, x, weights, bias, *, tm=None, tk=None):
    """Pallas implementation of GCNLayer.forward (block-sparse adjacency)."""
    N, F_in = x.shape
    F_out = weights.shape[1]
    assert adj.shape == (N, N)

    if tm is None:
        tm = min(N, 256)
    if tk is None:
        tk = min(N, 256)
    # TODO(synk): pad N for arbitrary graph sizes; here we require exact tiling.
    assert N % tm == 0 and N % tk == 0

    n_row = N // tm
    n_col = N // tk

    # ---- block-sparsity metadata (preprocessing, outside the kernel) --------
    blk_nz = jnp.abs(adj).reshape(n_row, tm, n_col, tk).sum(axis=(1, 3)) > 0
    counts = blk_nz.sum(axis=1).astype(jnp.int32)           # (n_row,)
    max_nnz = max(int(jnp.max(counts)), 1)                   # static grid extent
    # Nonzero column-block ids first (ascending), zero blocks after.
    order = jnp.argsort(jnp.logical_not(blk_nz), axis=1, stable=True).astype(jnp.int32)
    # Pad the tail by repeating the last valid block id: padded steps re-fetch
    # the block already resident in VMEM (no new DMA) and compute is gated off.
    k_idx = jnp.arange(max_nnz, dtype=jnp.int32)[None, :]
    safe_k = jnp.minimum(k_idx, jnp.maximum(counts - 1, 0)[:, None])
    cols = jnp.take_along_axis(order, safe_k, axis=1)        # (n_row, max_nnz)

    # ---- dtypes and lane-dense padding of the output feature dim ------------
    F_out_p = ((F_out + 127) // 128) * 128
    adj_bf = adj.astype(jnp.bfloat16)
    x_bf = x.astype(jnp.bfloat16)
    w_p = jnp.zeros((F_in, F_out_p), jnp.float32).at[:, :F_out].set(
        weights.astype(jnp.float32)
    )
    b_p = jnp.zeros((1, F_out_p), jnp.float32).at[:, :F_out].set(
        bias.astype(jnp.float32)
    )

    out_p = pl.pallas_call(
        gcn_kernel,
        out_shape=jax.ShapeDtypeStruct((N, F_out_p), jnp.float32),
        grid_spec=pltpu.PrefetchScalarGridSpec(
            num_scalar_prefetch=2,
            grid=(n_row, max_nnz),
            in_specs=[
                # adjacency block: row tile i, k-th nonzero column block
                pl.BlockSpec((tm, tk), lambda i, k, cols, counts: (i, cols[i, k])),
                # matching x block
                pl.BlockSpec((tk, F_in), lambda i, k, cols, counts: (cols[i, k], 0)),
                # weights and bias: grid-invariant
                pl.BlockSpec((F_in, F_out_p), lambda i, k, cols, counts: (0, 0)),
                pl.BlockSpec((1, F_out_p), lambda i, k, cols, counts: (0, 0)),
            ],
            out_specs=pl.BlockSpec((tm, F_out_p), lambda i, k, cols, counts: (i, 0)),
            scratch_shapes=[pltpu.VMEM((tm, F_in), jnp.float32)],
        ),
        compiler_params=pltpu.CompilerParams(
            dimension_semantics=("parallel", "arbitrary"),
        ),
    )(cols, counts, adj_bf, x_bf, w_p, b_p)

    return out_p[:, :F_out]


def init_gcn_params(key, in_channels, out_channels):
    """Deterministic Xavier-uniform weights (as in reset_parameters), zero bias."""
    bound = (6.0 / (in_channels + out_channels)) ** 0.5
    weights = jax.random.uniform(
        key, (in_channels, out_channels), jnp.float32, minval=-bound, maxval=bound
    )
    bias = jnp.zeros((out_channels,), jnp.float32)
    return weights, bias


if __name__ == "__main__":
    # Small GCN problem: N nodes, in/out feature channels.
    N, F_in, F_out = 512, 32, 64
    tm = tk = 128

    root = jax.random.PRNGKey(0)
    k_x, k_adj, k_w = jax.random.split(root, 3)

    # Node features.
    x = jax.random.normal(k_x, (N, F_in), jnp.float32)

    # Banded sparse adjacency (nodes only connect to nearby nodes) + self loops,
    # symmetrically normalized (typical GCN preprocessing). The band structure
    # produces genuinely all-zero (tm, tk) blocks, exercising the sparse skip.
    idx = jnp.arange(N)
    band = jnp.abs(idx[:, None] - idx[None, :]) <= 24
    rnd = jax.random.uniform(k_adj, (N, N)) < 0.3
    edges = (band & rnd).astype(jnp.float32)
    adj = jnp.maximum(edges, edges.T) + jnp.eye(N, dtype=jnp.float32)
    deg = jnp.sum(adj, axis=1)
    d_inv_sqrt = 1.0 / jnp.sqrt(deg)
    adj = adj * d_inv_sqrt[:, None] * d_inv_sqrt[None, :]

    weights, bias = init_gcn_params(k_w, F_in, F_out)

    out = gcn_forward(adj, x, weights, bias, tm=tm, tk=tk)
    out = jax.block_until_ready(out)

    # Reference check (same math as the torch forward). The kernel streams
    # adj/x in bf16, so compare tightly against a bf16-cast reference and
    # loosely against the full-f32 reference.
    adj_b = adj.astype(jnp.bfloat16).astype(jnp.float32)
    x_b = x.astype(jnp.bfloat16).astype(jnp.float32)
    ref_bf16 = (adj_b @ x_b) @ weights + bias[None, :]
    ref_f32 = (adj @ x) @ weights + bias[None, :]

    assert out.shape == (N, F_out)
    assert jnp.allclose(out, ref_bf16, atol=2e-3, rtol=2e-3)
    assert jnp.allclose(out, ref_f32, atol=2e-2, rtol=2e-2)

    print("KERNEL_OK")
</pallas_src>

<mosaic_0001>
module attributes {stable_mosaic.version = 11 : i64} {
  func.func @gcn_kernel(%arg0: i32, %arg1: i32, %arg2: memref<4x3xi32, #tpu.memory_space<smem>>, %arg3: memref<4xi32, #tpu.memory_space<smem>>, %arg4: memref<128x128xbf16, #tpu.memory_space<vmem>>, %arg5: memref<128x32xbf16, #tpu.memory_space<vmem>>, %arg6: memref<32x128xf32, #tpu.memory_space<vmem>>, %arg7: memref<1x128xf32, #tpu.memory_space<vmem>>, %arg8: memref<128x128xf32, #tpu.memory_space<vmem>>, %arg9: memref<128x32xf32, #tpu.memory_space<vmem>>) attributes {dimension_semantics = [#tpu.dimension_semantics<parallel>, #tpu.dimension_semantics<arbitrary>], iteration_bounds = array<i64: 4, 3>, scalar_prefetch = 2 : i64, scratch_operands = 1 : i64, tpu.core_type = #tpu.core_type<tc>, window_params = [{transform_indices = @transform_0, window_bounds = array<i64: 128, 128>}, {transform_indices = @transform_1, window_bounds = array<i64: 128, 32>}, {pipeline_mode = #tpu.pipeline_mode<synchronous>, transform_indices = @transform_2, window_bounds = array<i64: 32, 128>}, {pipeline_mode = #tpu.pipeline_mode<synchronous>, transform_indices = @transform_3, window_bounds = array<i64: 1, 128>}, {transform_indices = @transform_4, window_bounds = array<i64: 128, 128>}]} {
    %c0_i32 = arith.constant 0 : i32
    %0 = arith.cmpi eq, %arg1, %c0_i32 : i32
    %1 = arith.extui %0 : i1 to i32
    %c0_i32_0 = arith.constant 0 : i32
    %2 = arith.cmpi ne, %1, %c0_i32_0 : i32
    scf.if %2 {
      %cst = arith.constant 0.000000e+00 : f32
      %11 = vector.broadcast %cst : f32 to vector<128x32xf32>
      %c0 = arith.constant 0 : index
      %c0_3 = arith.constant 0 : index
      %12 = vector.load %arg9[%c0, %c0_3] : memref<128x32xf32, #tpu.memory_space<vmem>>, vector<128x32xf32>
      tpu.vector_store %arg9[%c0, %c0_3], %11 {strides = array<i32>} : memref<128x32xf32, #tpu.memory_space<vmem>>, vector<128x32xf32>,
    } else {
    }
    %3 = arith.index_cast %arg0 : i32 to index
    %4 = memref.load %arg3[%3] : memref<4xi32, #tpu.memory_space<smem>>
    %5 = arith.cmpi slt, %arg1, %4 : i32
    %6 = arith.extui %5 : i1 to i32
    %c0_i32_1 = arith.constant 0 : i32
    %7 = arith.cmpi ne, %6, %c0_i32_1 : i32
    scf.if %7 {
      %c0 = arith.constant 0 : index
      %c0_3 = arith.constant 0 : index
      %11 = vector.load %arg9[%c0, %c0_3] : memref<128x32xf32, #tpu.memory_space<vmem>>, vector<128x32xf32>
      %c0_4 = arith.constant 0 : index
      %c0_5 = arith.constant 0 : index
      %12 = vector.load %arg4[%c0_4, %c0_5] : memref<128x128xbf16, #tpu.memory_space<vmem>>, vector<128x128xbf16>
      %c0_6 = arith.constant 0 : index
      %c0_7 = arith.constant 0 : index
      %13 = vector.load %arg5[%c0_6, %c0_7] : memref<128x32xbf16, #tpu.memory_space<vmem>>, vector<128x32xbf16>
      %cst = arith.constant dense<0.000000e+00> : vector<128x32xf32>
      %14 = tpu.matmul %12, %13, %cst {dimension_numbers = #tpu.dot_dimension_numbers<[1], [0], [0], [1], [0, 0, 1, 1], [], []>} : vector<128x128xbf16>, vector<128x32xbf16>, vector<128x32xf32> -> vector<128x32xf32>
      %15 = arith.addf %11, %14 : vector<128x32xf32>
      %c0_8 = arith.constant 0 : index
      %c0_9 = arith.constant 0 : index
      %16 = vector.load %arg9[%c0_8, %c0_9] : memref<128x32xf32, #tpu.memory_space<vmem>>, vector<128x32xf32>
      tpu.vector_store %arg9[%c0_8, %c0_9], %15 {strides = array<i32>} : memref<128x32xf32, #tpu.memory_space<vmem>>, vector<128x32xf32>,
    } else {
    }
    %c2_i32 = arith.constant 2 : i32
    %8 = arith.cmpi eq, %arg1, %c2_i32 : i32
    %9 = arith.extui %8 : i1 to i32
    %c0_i32_2 = arith.constant 0 : i32
    %10 = arith.cmpi ne, %9, %c0_i32_2 : i32
    scf.if %10 {
      %c0 = arith.constant 0 : index
      %c0_3 = arith.constant 0 : index
      %11 = vector.load %arg9[%c0, %c0_3] : memref<128x32xf32, #tpu.memory_space<vmem>>, vector<128x32xf32>
      %c0_4 = arith.constant 0 : index
      %c0_5 = arith.constant 0 : index
      %12 = vector.load %arg6[%c0_4, %c0_5] : memref<32x128xf32, #tpu.memory_space<vmem>>, vector<32x128xf32>
      %cst = arith.constant dense<0.000000e+00> : vector<128x128xf32>
      %13 = tpu.matmul %11, %12, %cst {dimension_numbers = #tpu.dot_dimension_numbers<[1], [0], [0], [1], [0, 0, 1, 1], [], []>} : vector<128x32xf32>, vector<32x128xf32>, vector<128x128xf32> -> vector<128x128xf32>
      %c0_6 = arith.constant 0 : index
      %c0_7 = arith.constant 0 : index
      %14 = vector.load %arg7[%c0_6, %c0_7] : memref<1x128xf32, #tpu.memory_space<vmem>>, vector<1x128xf32>
      %15 = vector.broadcast %14 : vector<1x128xf32> to vector<128x128xf32>
      %16 = arith.addf %13, %15 : vector<128x128xf32>
      %c0_8 = arith.constant 0 : index
      %c0_9 = arith.constant 0 : index
      %17 = vector.load %arg8[%c0_8, %c0_9] : memref<128x128xf32, #tpu.memory_space<vmem>>, vector<128x128xf32>
      tpu.vector_store %arg8[%c0_8, %c0_9], %16 {strides = array<i32>} : memref<128x128xf32, #tpu.memory_space<vmem>>, vector<128x128xf32>,
    } else {
    }
    return
  }
  func.func @transform_0(%arg0: i32, %arg1: i32, %arg2: memref<4x3xi32, #tpu.memory_space<smem>>, %arg3: memref<4xi32, #tpu.memory_space<smem>>) -> (i32, i32) {
    %0 = arith.index_cast %arg0 : i32 to index
    %1 = arith.index_cast %arg1 : i32 to index
    %2 = memref.load %arg2[%0, %1] : memref<4x3xi32, #tpu.memory_space<smem>>
    %c0_i32 = arith.constant 0 : i32
    return %arg0, %2 : i32, i32
  }
  func.func @transform_1(%arg0: i32, %arg1: i32, %arg2: memref<4x3xi32, #tpu.memory_space<smem>>, %arg3: memref<4xi32, #tpu.memory_space<smem>>) -> (i32, i32) {
    %0 = arith.index_cast %arg0 : i32 to index
    %1 = arith.index_cast %arg1 : i32 to index
    %2 = memref.load %arg2[%0, %1] : memref<4x3xi32, #tpu.memory_space<smem>>
    %c0_i32 = arith.constant 0 : i32
    %c0_i32_0 = arith.constant 0 : i32
    return %2, %c0_i32 : i32, i32
  }
  func.func @transform_2(%arg0: i32, %arg1: i32, %arg2: memref<4x3xi32, #tpu.memory_space<smem>>, %arg3: memref<4xi32, #tpu.memory_space<smem>>) -> (i32, i32) {
    %c0_i32 = arith.constant 0 : i32
    %c0_i32_0 = arith.constant 0 : i32
    %c0_i32_1 = arith.constant 0 : i32
    return %c0_i32, %c0_i32_0 : i32, i32
  }
  func.func @transform_3(%arg0: i32, %arg1: i32, %arg2: memref<4x3xi32, #tpu.memory_space<smem>>, %arg3: memref<4xi32, #tpu.memory_space<smem>>) -> (i32, i32) {
    %c0_i32 = arith.constant 0 : i32
    %c0_i32_0 = arith.constant 0 : i32
    %c0_i32_1 = arith.constant 0 : i32
    return %c0_i32, %c0_i32_0 : i32, i32
  }
  func.func @transform_4(%arg0: i32, %arg1: i32, %arg2: memref<4x3xi32, #tpu.memory_space<smem>>, %arg3: memref<4xi32, #tpu.memory_space<smem>>) -> (i32, i32) {
    %c0_i32 = arith.constant 0 : i32
    %c0_i32_0 = arith.constant 0 : i32
    return %arg0, %c0_i32 : i32, i32
  }
}

</mosaic_0001>

<bundles_post_ra>
// kernel: tpu_custom_call.1
= control target key start
LH: loop header
LB: loop body
LE: loop exit
PB: predicated region body
PF: predicated region fallthrough
CT: control target
= control target key end

     0   :  { %s1900_s0 = inlined_call_operand.vmem [shape: s32[4,3], index: 0, kind: input, shape index: {}]   ;;  %s1901_s2 = inlined_call_operand.hbm [shape: bf16[512,512], index: 2, kind: input, shape index: {}]   ;;  %s1902_s3 = inlined_call_operand.vmem [shape: bf16[512,32], index: 3, kind: input, shape index: {}]   ;;  %s1903_s4 = inlined_call_operand.vmem [shape: f32[32,128], index: 4, kind: input, shape index: {}]   ;;  %s1904_s5 = inlined_call_operand.vmem [shape: f32[1,128], index: 5, kind: input, shape index: {}]   ;;  %s1905_s6 = inlined_call_operand.hbm [shape: f32[512,128], index: 6, kind: output, shape index: {}]   ;;  %s1906_s1 = inlined_call_operand.vmem [shape: s32[4], index: 1, kind: input, shape index: {}]  }
   0x1   :  { %s11_s23 = sshll.u32 %s1900_s0, 4  ;;  %s15_s26 = sshll.u32 %s1906_s1, 4  ;;  %s12_s23 = int_to_ptr.vmem [resolvable:$true] %s11_s23  ;;  %s16_s26 = int_to_ptr.vmem [resolvable:$true] %s15_s26 }
   0x2   :  { %s1326_s27 = scalar_lea.vmem %s12_s23, 64  ;;  %p1331_p1 = scmp.lt.s32.totalorder %s12_s23, %s12_s23 }
   0x3   :  { %p1327_p0 = scmp.ne.s32.totalorder %s12_s23, %s1326_s27  ;;  %p1332_p2 = scmp.lt.s32.totalorder %s1326_s27, %s1326_s27 }
   0x5   :  { %p1333_p3 = por %p1332_p2, %p1331_p1 }
   0x7   :  { %p1334_p4 = pnand %p1333_p3, %p1327_p0 }
   0x9   :  { %1337 = shalt.err (!%p1334_p4)  }
   0xa   :  { %s1502_s28 = smov [#allocation4]   ;;  %s1338_s29 = scalar_lea.vmem %s16_s26, 16 }
   0xb   :  { %14 = dma.vmem_to_smem %s12_s23, 64, %s1502_s28, [#allocation3] }
   0xc   :  { %p1339_p5 = scmp.ne.s32.totalorder %s16_s26, %s1338_s29  ;;  %p1343_p6 = scmp.lt.s32.totalorder %s16_s26, %s16_s26 }
   0xd   :  { %p1344_p7 = scmp.lt.s32.totalorder %s1338_s29, %s1338_s29 }
   0xf   :  { %p1345_p8 = por %p1344_p7, %p1343_p6 }
  0x11   :  { %p1346_p9 = pnand %p1345_p8, %p1339_p5 }
  0x13   :  { %1349 = shalt.err (!%p1346_p9)  }
  0x14   :  { %s1503_s0 = smov [#allocation5]  }
  0x15   :  { %18 = dma.vmem_to_smem %s16_s26, 16, %s1503_s0, [#allocation3] }
  0x16   :  { %1448 = dma.done.wait [#allocation3], 80 }
  0x17   :  { %1449 = vsyncadd [#allocation3], 4294967216 }
  0x18   :  { %20 = sfence }
  0x19   :  { %21 = vsyncpa [#allocation7], 0 }
  0x1a   :  { %23 = vsyncpa [#allocation7 + $0x1], 0 }
  0x1b   :  { %24 = vsyncpa [#allocation8], 0 }
  0x1c   :  { %26 = vsyncpa [#allocation8 + $0x1], 0  ;;  %s1553_s1 = smov 0   ;;  %s1555_s30 = smov 0  }
  0x1d   :  { %s1557_s7 = smov 0   ;;  %s1559_s8 = smov 0  }
  0x1e   :  { %s1561_s9 = smov 0   ;;  %s1563_s10 = smov 0  }
  0x1f   :  { %s1565_s11 = smov 0   ;;  %s1567_s12 = smov 0  }
  0x20   :  { %s1569_s13 = smov 0   ;;  %s1571_s14 = smov 0  }
  0x21   :  { %s1573_s15 = smov 0  }
  0x22 LB: > { %1913 = sst [smem:[#allocation15_spill]] %s1480_s10  ;;  %s1010_s16 = sadd.s32 4294967295, %s1500_s15   ;;  %s1500_s15 = sphi %s1573_s15, %s32_s15   ;;  %s1496_s14 = sphi %s1571_s14, %s1940_s14   ;;  %s1492_s13 = sphi %s1569_s13, %s1932_s13   ;;  %s1488_s12 = sphi %s1567_s12, %s1939_s12   ;;  %s1484_s11 = sphi %s1565_s11, %s1931_s11   ;;  %s1480_s10 = sphi %s1563_s10, %s1930_s10   ;;  %s1476_s9 = sphi %s1561_s9, %s1938_s9   ;;  %s1472_s8 = sphi %s1559_s8, %s1937_s8   ;;  %s1468_s7 = sphi %s1557_s7, %s1936_s7   ;;  %s1464_s30 = sphi %s1555_s30, %s1935_s30   ;;  %s1460_s1 = sphi %s1553_s1, %s1934_s1  }
  0x23   : > { %1914 = sst [smem:[#allocation16_spill]] %s1492_s13  ;;  %s41_s17 = sadd.s32 1, %s1492_s13 }
  0x24   : > { %s44_s18 = sadd.s32 1, %s1496_s14  ;;  %p42_p10 = scmp.ge.s32.totalorder %s41_s17, 3 }
  0x25   : > { %s48_s19 = sshra.s32 %s1492_s13, 7  ;;  %s53_s21 = sand.u32 127, %s1492_s13 }
  0x26   : > { %s50_s20 = sadd.s32 %s1496_s14, %s48_s19  ;;  %s1942_s17 = smov (%p42_p10, %s41_s17), 0 }
  0x27   : > { %1915 = sst [smem:[#allocation17_spill]] %s1942_s17  ;;  %s1944_s18 = smov (!%p42_p10, %s44_s18), %s1496_s14 }
  0x28   : > { %s1011_s22 = sadd.s32 4294967294, %s1500_s15   ;;  %s1012_s23 = sshll.u32 %s50_s20, 7 }
  0x29   : > { %p46_p11 = scmp.ge.s32.totalorder %s1944_s18, 4  ;;  %s1618_s24 = sadd.s32 %s1012_s23, %s53_s21 }
  0x2a   : > { %s55_s25 = sld [smem:[#allocation4 + %s1618_s24]]  ;;  %s56_s26 = sshra.s32 %s1942_s17, 7 }
  0x2b   : > { %s1946_s18 = smov (%p46_p11, %s1944_s18), 0  ;;  %s61_s27 = sand.u32 127, %s1942_s17 }
  0x2c   : > { %1916 = sst [smem:[#allocation18_spill]] %s1946_s18  ;;  %s69_s28 = sadd.s32 1, %s1480_s10 }
  0x2d   : > { %s58_s29 = sadd.s32 %s56_s26, %s1946_s18  ;;  %p76_p12 = scmp.ne.s32.totalorder %s1480_s10, %s1476_s9 }
  0x2e   : > { %s1013_s0 = sshll.u32 %s58_s29, 7  ;;  %s64_s19 = ssub.s32 %s1496_s14, %s1946_s18 }
  0x2f   : > { %s62_s20 = sadd.s32 %s1013_s0, %s61_s27  ;;  %p82_p13 = scmp.ne.s32.totalorder %s1476_s9, %s1472_s8 }
  0x30   : > { %s63_s21 = sld [smem:[#allocation4 + %s62_s20]]  ;;  %p77_p0 = scmp.eq.s32.totalorder %s1500_s15, 0 }
  0x31   : > { %p83_p1 = scmp.eq.s32.totalorder %s1010_s16, 0  ;;  %p177_p2 = scmp.eq.s32.totalorder %s64_s19, 0 }
  0x32   : > { %s179_s23 = sadd.s32 1, %s1468_s7  ;;  %p189_p3 = scmp.ne.s32.totalorder %s1468_s7, %s1464_s30 }
  0x33   : > { %p1639_p4 = por %p83_p1, %p82_p13  ;;  %p190_p5 = scmp.eq.s32.totalorder %s1010_s16, 11 }
  0x34   : > { %s1646_s8 = scalar_select %p177_p2, %s1468_s7, %s179_s23  }
  0x35   : > { %s1917_s26 = scalar_select %p1639_p4, 1, 0 }
  0x36   : > { %1918 = sst [smem:[#allocation19_spill]] %s1646_s8  ;;  %p1648_p6 = por %p190_p5, %p189_p3 }
  0x37   : > { %p195_p7 = scmp.ne.s32.totalorder %s1464_s30, %s1460_s1  ;;  %s65_s29 = ssub.s32 %s55_s25, %s63_s21 }
  0x38   : > { %s1919_s27 = scalar_select %p1648_p6, 1, 0 }
  0x39   : > { %p196_p8 = scmp.eq.s32.totalorder %s1011_s22, 11  ;;  %s66_s0 = sor.u32 %s65_s29, %s64_s19 }
  0x3a   : > { %p67_p9 = scmp.eq.s32.totalorder %s66_s0, 0  ;;  %p78_p11 = por %p77_p0, %p76_p12 }
  0x3b   : > { %p1654_p10 = por %p196_p8, %p195_p7  ;;  %s222_s16 = sand.u32 1, %s1480_s10  }
  0x3c   : > { %s1665_s23 = scalar_select %p67_p9, %s1480_s10, %s69_s28  }
  0x3d   : > { %s1920_s20 = scalar_select %p1654_p10, 1, 0 }
  0x3e   : > { %1921 = sst [smem:[#allocation20_spill]] %s1665_s23  ;;  %p1212_p13 = scmp.lt.s32.totalorder %s1500_s15, 12 }
  0x3f   : > { %s1018_s18 = sshll.u32 %s222_s16, 6  ;;  %s1948_s24 = smov (!%p78_p11, %s1618_s24), 0 }
  0x40   : > { %s1196_s17 = scalar_select %p78_p11, [#allocation4], [#allocation10] }
  0x41   : > { %s1952_s24 = smov (!%p1212_p13, %s1948_s24), 0  ;;  %p1669_p1 = pnand %p1212_p13, %p78_p11 }
  0x42   : > { %s1950_s17 = smov (!%p1212_p13, %s1196_s17), [#allocation11]  ;;  %s226_s19 = scalar_lea.vmem [#allocation6], %s1018_s18 }
  0x43   : > { %s234_s25 = sld [smem:[%s1950_s17 + %s1952_s24]]  ;;  %s243_s21 = sshll.u32 %s226_s19, 4  ;;  %s1676_s21 = int_to_ptr.vmem [resolvable:$true] %s243_s21 }
  0x44   : > { %s1070_s29 = sshll.u32 %s1496_s14, 6  ;;  %p1023_p2 = scmp.ge.s32.totalorder %s1500_s15, 1 }
  0x45   : > { %p276_p12 = scmp.lt.s32.totalorder %s1500_s15, 13  ;;  %s1687_s17 = scalar_lea.sflag [#allocation7], %s222_s16 }
  0x46   : > { %p1352_p5 = pneg %p1669_p1 }
  0x47   : > { %p1678_p0 = pnand %p1023_p2, %p276_p12 }
  0x49   : > { %s1923_s28 = scalar_select %p1678_p0, 1, 0 }
  0x4a   : > { %s240_s0 = sadd.s32 %s1070_s29, %s234_s25  ;;  %s1355_s25 = scalar_lea.hbm %s1901_s2, 16384 }
  0x4b   : > { %s1022_s13 = sshll.u32 %s240_s0, 6 }
  0x4c   : > { %s1685_s8 = scalar_lea.hbm %s1901_s2, %s1022_s13 }
  0x4d   : > { %s1350_s18 = scalar_lea.hbm %s1685_s8, 1024  ;;  %p1356_p9 = scmp.lt.s32.totalorder %s1685_s8, %s1901_s2 }
  0x4e   : > { %p1351_p3 = scmp.ne.s32.totalorder %s1685_s8, %s1350_s18  ;;  %p1357_p11 = scmp.lt.s32.totalorder %s1355_s25, %s1350_s18 }
  0x50   : > { %p1353_p7 = pnand %p1352_p5, %p1351_p3  ;;  %p1358_p13 = por %p1357_p11, %p1356_p9 }
  0x52   : > { %p1354_p8 = pneg %p1353_p7 }
  0x54   : > { %p1359_p2 = pnand %p1358_p13, %p1354_p8 }
  0x56   : > { %1362 = shalt.err (!%p1359_p2)
}
  0x57   : > { %s1363_s10 = scalar_lea.vmem %s1676_s21, 1024  ;;  %s1504_s13 = smov [#allocation6]  }
  0x58   : > { %p1364_p12 = scmp.ne.s32.totalorder %s1676_s21, %s1363_s10  ;;  %s1368_s16 = sshll.u32 %s1504_s13, 4  ;;  %s1369_s16 = int_to_ptr.vmem [resolvable:$false] %s1368_s16 }
  0x59   : > { %s1370_s23 = scalar_lea.vmem %s1369_s16, 2048  ;;  %p1371_p7 = scmp.lt.s32.totalorder %s1676_s21, %s1369_s16 }
  0x5a   : > { %p1366_p10 = pnand %p1364_p12, %p1352_p5  ;;  %p1372_p6 = scmp.lt.s32.totalorder %s1370_s23, %s1363_s10 }
  0x5c   : > { %p1367_p3 = pneg %p1366_p10  ;;  %p1373_p4 = por %p1372_p6, %p1371_p7 }
  0x5e   : > { %p1374_p0 = pnand %p1373_p4, %p1367_p3 }
  0x60   : > { %1377 = shalt.err (!%p1374_p0)
}
  0x61   : > { %s1505_s18 = smov 256   ;;  %s1506_s24 = smov 64  }
  0x62   : > { %s1507_s19 = smov 4   ;;  %p1924_p10 = scmp.ne.s32.totalorder %s1923_s28, 0 }
  0x63   : > { %1207 = dma.hbm_to_vmem [thread:$0]  (!%p1669_p1), %s1685_s8, 1024, %s1676_s21, %s1687_s17, %s1505_s18, %s1506_s24, %s1507_s19  }
  0x64   : > { %280 = sbr.rel (%p1924_p10) target bundleno = 639 (0x27f), region = 36  ;;  %s282_s25 = sand.u32 (!%p1924_p10), 1, %s1476_s9  }
  0x65   : > { %s1024_s29 = sshll.u32 (!%p1924_p10), %s282_s25, 6  ;;  %s283_s0 = scalar_lea.sflag (!%p1924_p10), [#allocation7], %s282_s25 }
  0x66   : > { %s1711_s10 = scalar_lea.vmem (!%p1924_p10), [#allocation6], %s1024_s29  ;;  %p1925_p4 = scmp.ne.s32.totalorder (!%p1924_p10), %s1917_s26, 0 }
  0x69   : > { %1451 = dma.done.wait (%p1925_p4), %s283_s0, 1024  }
  0x6a   : > { %1453 = vsyncadd (%p1925_p4), %s283_s0, 4294966272  ;;  %s333_s8 = sshra.s32 %s1484_s11, 7  ;;  %s338_s22 = sand.u32 127, %s1484_s11 }
  0x6b   : > { %s335_s21 = sadd.s32 %s1488_s12, %s333_s8  ;;  %s321_s28 = sand.u32 1, %s1464_s30  }
  0x6c   : > { %s1026_s17 = sshll.u32 %s335_s21, 7  ;;  %s1025_s13 = sshll.u32 %s321_s28, 7 }
  0x6d   : > { %s339_s16 = sadd.s32 %s1026_s17, %s338_s22  ;;  %s1728_s29 = scalar_lea.vmem [#allocation9], %s1025_s13 }
  0x6e   : > { %s340_s23 = sld [smem:[#allocation4 + %s339_s16]]  ;;  %p1029_p1 = scmp.ne.s32.totalorder %s1484_s11, 0 }
  0x74   : > { %s1027_s18 = sshll.u32 %s340_s23, 4 }
  0x75   : > { %p342_p6 = scmp.lt.s32.totalorder %s1027_s18, 63  ;;  %360 = sbr.rel (%p1029_p1) target bundleno = 131 (0x83), region = 44 }
  0x77   : > { %s1954_s18 = smov (!%p342_p6, %s1027_s18), 63 }
  0x78   : > { %s1028_s24 = sshll.u32 %s1954_s18, 2 }
  0x79   : > { %s1726_s25 = scalar_lea.vmem %s1902_s3, %s1028_s24 }
  0x7a   : > { %vm361_vm0 = vcmask 261120   ;;  %v1508_v0 = vmov 0.0  }
  0x7b   : > { %362 = vst.msk [vmem:[#allocation2] sm:$0xff] %vm361_vm0, %v1508_v0  ;;  %363 = vst.msk [vmem:[#allocation2 + $0x8] sm:$0xff] %vm361_vm0, %v1508_v0 }
  0x7c   : > { %364 = vst.msk [vmem:[#allocation2 + $0x10] sm:$0xff] %vm361_vm0, %v1508_v0  ;;  %365 = vst.msk [vmem:[#allocation2 + $0x18] sm:$0xff] %vm361_vm0, %v1508_v0 }
  0x7d   : > { %366 = vst.msk [vmem:[#allocation2 + $0x20] sm:$0xff] %vm361_vm0, %v1508_v0  ;;  %367 = vst.msk [vmem:[#allocation2 + $0x28] sm:$0xff] %vm361_vm0, %v1508_v0 }
  0x7e   : > { %368 = vst.msk [vmem:[#allocation2 + $0x30] sm:$0xff] %vm361_vm0, %v1508_v0  ;;  %369 = vst.msk [vmem:[#allocation2 + $0x38] sm:$0xff] %vm361_vm0, %v1508_v0 }
  0x7f   : > { %370 = vst.msk [vmem:[#allocation2 + $0x40] sm:$0xff] %vm361_vm0, %v1508_v0  ;;  %371 = vst.msk [vmem:[#allocation2 + $0x48] sm:$0xff] %vm361_vm0, %v1508_v0 }
  0x80   : > { %372 = vst.msk [vmem:[#allocation2 + $0x50] sm:$0xff] %vm361_vm0, %v1508_v0  ;;  %373 = vst.msk [vmem:[#allocation2 + $0x58] sm:$0xff] %vm361_vm0, %v1508_v0 }
  0x81   : > { %374 = vst.msk [vmem:[#allocation2 + $0x60] sm:$0xff] %vm361_vm0, %v1508_v0  ;;  %375 = vst.msk [vmem:[#allocation2 + $0x68] sm:$0xff] %vm361_vm0, %v1508_v0 }
  0x82   : > { %376 = vst.msk [vmem:[#allocation2 + $0x70] sm:$0xff] %vm361_vm0, %v1508_v0  ;;  %377 = vst.msk [vmem:[#allocation2 + $0x78] sm:$0xff] %vm361_vm0, %v1508_v0 }
  0x83 PF: > { %s378_s0 = sld [smem:[#allocation5 + %s1488_s12]] }
  0x89   : > { %p1030_p0 = scmp.ge.s32.totalorder %s1484_s11, %s378_s0 }
  0x8b   : > { %382 = sbr.rel (%p1030_p0) target bundleno = 387 (0x183), region = 48 }
  0x90   : > { %v1310_v1 = vld [vmem:[%s1726_s25 + $0x38] sm:$0xff]   ;;  %v1311_v2 = vld [vmem:[%s1726_s25 + $0x30] sm:$0xff]   ;;  %v1312_v3 = vld [vmem:[%s1726_s25 + $0x28] sm:$0xff]   ;;  %vm640_vm1 = vcmask 261120  }
  0x91   : > { %1108 = vmatprep.subr.bf16.mxu0 %v1310_v1  ;;  %1172 = vmatprep.subr.bf16.mxu1 %v1310_v1  ;;  %v1313_v4 = vld [vmem:[%s1726_s25 + $0x20] sm:$0xff]   ;;  %v1314_v7 = vld [vmem:[%s1726_s25 + $0x18] sm:$0xff]   ;;  %v1315_v8 = vld [vmem:[%s1726_s25 + $0x10] sm:$0xff]  }
  0x92   : > { %1109 = vmatpush3.bf16.msra.mxu0 %v1310_v1  ;;  %1180 = vmatpush3.bf16.msra.mxu1 %v1310_v1  ;;  %v1318_v5 = vld [vmem:[%s1711_s10] sm:$0xff]   ;;  %v1316_v9 = vld [vmem:[%s1726_s25 + $0x8] sm:$0xff]   ;;  %v1322_v13 = vld [vmem:[%s1711_s10 + $0x10] sm:$0xff]  }
  0x93   : > { %1110 = vmatprep.subr.bf16.mxu0 %v1311_v2  ;;  %1173 = vmatprep.subr.bf16.mxu1 %v1311_v2  ;;  %v1319_v6 = vld [vmem:[%s1711_s10 + $0x20] sm:$0xff]   ;;  %v1320_v11 = vld [vmem:[%s1711_s10 + $0x8] sm:$0xff]   ;;  %v1323_v14 = vld [vmem:[%s1711_s10 + $0x30] sm:$0xff]  }
  0x94   : > { %1124 = vmatprep.mubr.bf16.mxu0 %v1318_v5  ;;  %1132 = vmatprep.mubr.bf16.mxu1 %v1319_v6  ;;  %v1317_v10 = vld [vmem:[%s1726_s25] sm:$0xff]   ;;  %v1321_v12 = vld [vmem:[%s1711_s10 + $0x28] sm:$0xff]   ;;  %v1324_v15 = vld [vmem:[%s1711_s10 + $0x18] sm:$0xff]  }
  0x95   : > { %v1325_v16 = vld [vmem:[%s1711_s10 + $0x38] sm:$0xff]   ;;  %v385_v17 = vld [vmem:[#allocation2 + $0x10] sm:$0xff]  ;;  %v383_v21 = vld [vmem:[#allocation2] sm:$0xff] }
  0x96   : > { %1111 = vmatpush3.bf16.msra.mxu0 %v1311_v2  ;;  %1181 = vmatpush3.bf16.msra.mxu1 %v1311_v2  ;;  %v393_v18 = vld [vmem:[#allocation2 + $0x50] sm:$0xff]  ;;  %v391_v22 = vld [vmem:[#allocation2 + $0x40] sm:$0xff]  ;;  %v386_v27 = vld [vmem:[#allocation2 + $0x18] sm:$0xff] }
  0x97   : > { %1112 = vmatprep.subr.bf16.mxu0 %v1312_v3  ;;  %1174 = vmatprep.subr.bf16.mxu1 %v1312_v3  ;;  %v394_v28 = vld [vmem:[#allocation2 + $0x58] sm:$0xff]  ;;  %v384_v33 = vld [vmem:[#allocation2 + $0x8] sm:$0xff]  ;;  %v389_v39 = vld [vmem:[#allocation2 + $0x30] sm:$0xff] }
  0x98   : > { %v392_v34 = vld [vmem:[#allocation2 + $0x48] sm:$0xff]  ;;  %v397_v40 = vld [vmem:[#allocation2 + $0x70] sm:$0xff]  ;;  %v387_v45 = vld [vmem:[#allocation2 + $0x20] sm:$0xff] }
  0x99   : > { %v395_v46 = vld [vmem:[#allocation2 + $0x60] sm:$0xff]  ;;  %v390_v51 = vld [vmem:[#allocation2 + $0x38] sm:$0xff]  ;;  %v388_v57 = vld [vmem:[#allocation2 + $0x28] sm:$0xff] }
  0x9a   : > { %1113 = vmatpush3.bf16.msra.mxu0 %v1312_v3  ;;  %1182 = vmatpush3.bf16.msra.mxu1 %v1312_v3  ;;  %v398_v52 = vld [vmem:[#allocation2 + $0x78] sm:$0xff]  ;;  %v396_v58 = vld [vmem:[#allocation2 + $0x68] sm:$0xff] }
  0x9b   : > { %1114 = vmatprep.subr.bf16.mxu0 %v1313_v4  ;;  %1175 = vmatprep.subr.bf16.mxu1 %v1313_v4 }
  0x9e   : > { %1115 = vmatpush3.bf16.msra.mxu0 %v1313_v4  ;;  %1183 = vmatpush3.bf16.msra.mxu1 %v1313_v4 }
  0x9f   : > { %1116 = vmatprep.subr.bf16.mxu0 %v1314_v7  ;;  %1176 = vmatprep.subr.bf16.mxu1 %v1314_v7 }
  0xa2   : > { %1117 = vmatpush3.bf16.msra.mxu0 %v1314_v7  ;;  %1184 = vmatpush3.bf16.msra.mxu1 %v1314_v7 }
  0xa3   : > { %1118 = vmatprep.subr.bf16.mxu0 %v1315_v8  ;;  %1177 = vmatprep.subr.bf16.mxu1 %v1315_v8 }
  0xa6   : > { %1119 = vmatpush3.bf16.msra.mxu0 %v1315_v8  ;;  %1185 = vmatpush3.bf16.msra.mxu1 %v1315_v8 }
  0xa7   : > { %1120 = vmatprep.subr.bf16.mxu0 %v1316_v9  ;;  %1178 = vmatprep.subr.bf16.mxu1 %v1316_v9 }
  0xaa   : > { %1121 = vmatpush3.bf16.msra.mxu0 %v1316_v9  ;;  %1186 = vmatpush3.bf16.msra.mxu1 %v1316_v9 }
  0xab   : > { %1122 = vmatprep.subr.bf16.mxu0 %v1317_v10  ;;  %1179 = vmatprep.subr.bf16.mxu1 %v1317_v10 }
  0xae   : > { %1123 = vmatpush3.bf16.msra.mxu0 %v1317_v10  ;;  %1187 = vmatpush3.bf16.msra.mxu1 %v1317_v10 }
  0xb1   : > { %1125 = vmatmul.mubr.bf16.vlgmr.msra.gmra.mxu0 %v1320_v11  ;;  %1133 = vmatmul.mubr.bf16.vlgmr.msra.gmra.mxu1 %v1321_v12 }
  0xb2   : > { %1128 = vmatprep.mubr.bf16.mxu0 %v1322_v13  ;;  %1136 = vmatprep.mubr.bf16.mxu1 %v1323_v14 }
  0xb9   : > { %1129 = vmatmul.mubr.bf16.gmra.mxu0 %v1324_v15  ;;  %1137 = vmatmul.mubr.bf16.gmra.mxu1 %v1325_v16 }
 0x171   : > { %v1126_v19 = vpop.f32.mrf.mxu0  ;;  %v1134_v20 = vpop.f32.mrf.mxu1 }
 0x172   : > { %v626_v23 = vadd.f32 %v1126_v19, %v385_v17  ;;  %v634_v24 = vadd.f32 %v1134_v20, %v393_v18 }
 0x173   : > { %v561_v25 = vpop.f32.mrf.mxu0  ;;  %v593_v26 = vpop.f32.mrf.mxu1 }
 0x174   : > { %643 = vst.msk [vmem:[#allocation2 + $0x10] sm:$0xff] %vm640_vm1, %v626_v23  ;;  %651 = vst.msk [vmem:[#allocation2 + $0x50] sm:$0xff] %vm640_vm1, %v634_v24  ;;  %v624_v29 = vadd.f32 %v561_v25, %v383_v21  ;;  %v632_v30 = vadd.f32 %v593_v26, %v391_v22 }
 0x175   : > { %v1127_v31 = vpop.f32.mrf.mxu0  ;;  %v1135_v32 = vpop.f32.mrf.mxu1 }
 0x176   : > { %641 = vst.msk [vmem:[#allocation2] sm:$0xff] %vm640_vm1, %v624_v29  ;;  %649 = vst.msk [vmem:[#allocation2 + $0x40] sm:$0xff] %vm640_vm1, %v632_v30  ;;  %v627_v35 = vadd.f32 %v1127_v31, %v386_v27  ;;  %v635_v36 = vadd.f32 %v1135_v32, %v394_v28 }
 0x177   : > { %v564_v37 = vpop.f32.mrf.mxu0  ;;  %v596_v38 = vpop.f32.mrf.mxu1 }
 0x178   : > { %644 = vst.msk [vmem:[#allocation2 + $0x18] sm:$0xff] %vm640_vm1, %v627_v35  ;;  %652 = vst.msk [vmem:[#allocation2 + $0x58] sm:$0xff] %vm640_vm1, %v635_v36  ;;  %v625_v41 = vadd.f32 %v564_v37, %v384_v33  ;;  %v633_v42 = vadd.f32 %v596_v38, %v392_v34 }
 0x179   : > { %v1130_v43 = vpop.f32.mrf.mxu0  ;;  %v1138_v44 = vpop.f32.mrf.mxu1 }
 0x17a   : > { %642 = vst.msk [vmem:[#allocation2 + $0x8] sm:$0xff] %vm640_vm1, %v625_v41  ;;  %650 = vst.msk [vmem:[#allocation2 + $0x48] sm:$0xff] %vm640_vm1, %v633_v42  ;;  %v630_v47 = vadd.f32 %v1130_v43, %v389_v39  ;;  %v638_v48 = vadd.f32 %v1138_v44, %v397_v40 }
 0x17b   : > { %v577_v49 = vpop.f32.mrf.mxu0  ;;  %v609_v50 = vpop.f32.mrf.mxu1 }
 0x17c   : > { %647 = vst.msk [vmem:[#allocation2 + $0x30] sm:$0xff] %vm640_vm1, %v630_v47  ;;  %655 = vst.msk [vmem:[#allocation2 + $0x70] sm:$0xff] %vm640_vm1, %v638_v48  ;;  %v628_v53 = vadd.f32 %v577_v49, %v387_v45  ;;  %v636_v54 = vadd.f32 %v609_v50, %v395_v46 }
 0x17d   : > { %v1131_v55 = vpop.f32.mrf.mxu0  ;;  %v1139_v56 = vpop.f32.mrf.mxu1 }
 0x17e   : > { %645 = vst.msk [vmem:[#allocation2 + $0x20] sm:$0xff] %vm640_vm1, %v628_v53  ;;  %653 = vst.msk [vmem:[#allocation2 + $0x60] sm:$0xff] %vm640_vm1, %v636_v54  ;;  %v631_v59 = vadd.f32 %v1131_v55, %v390_v51  ;;  %v639_v60 = vadd.f32 %v1139_v56, %v398_v52 }
 0x17f   : > { %v580_v61 = vpop.f32.mrf.mxu0  ;;  %v612_v62 = vpop.f32.mrf.mxu1 }
 0x180   : > { %648 = vst.msk [vmem:[#allocation2 + $0x38] sm:$0xff] %vm640_vm1, %v631_v59  ;;  %656 = vst.msk [vmem:[#allocation2 + $0x78] sm:$0xff] %vm640_vm1, %v639_v60  ;;  %v629_v63 = vadd.f32 %v580_v61, %v388_v57  ;;  %v637_v0 = vadd.f32 %v612_v62, %v396_v58 }
 0x182   : > { %646 = vst.msk [vmem:[#allocation2 + $0x28] sm:$0xff] %vm640_vm1, %v629_v63  ;;  %654 = vst.msk [vmem:[#allocation2 + $0x68] sm:$0xff] %vm640_vm1, %v637_v0 }
 0x183 PF: > { %p1047_p5 = scmp.ne.s32.totalorder %s1484_s11, 2 }
 0x185   : > { %660 = sbr.rel (%p1047_p5) target bundleno = 614 (0x266), region = 52 }
 0x18a   : > { %v680_v1 = vld [vmem:[%s1903_s4 + $0x18] sm:$0xff]  ;;  %v679_v2 = vld [vmem:[%s1903_s4 + $0x10] sm:$0xff]  ;;  %v678_v3 = vld [vmem:[%s1903_s4 + $0x8] sm:$0xff]  ;;  %vm688_vm2 = vcmask 261120  }
 0x18b   : > { %1140 = vmatprep.subr.mxu0 %v680_v1  ;;  %1188 = vmatprep.subr.mxu1 %v680_v1  ;;  %v677_v4 = vld [vmem:[%s1903_s4] sm:$0xff]  ;;  %v662_v7 = vld [vmem:[#allocation2 + $0x8] sm:$0xff]  ;;  %v663_v9 = vld [vmem:[#allocation2 + $0x10] sm:$0xff] }
 0x18c   : > { %1141 = vmatpush3.msra.mxu0 %v680_v1  ;;  %1192 = vmatpush3.msra.mxu1 %v680_v1  ;;  %v661_v5 = vld [vmem:[#allocation2] sm:$0xff]  ;;  %v670_v8 = vld [vmem:[#allocation2 + $0x48] sm:$0xff]  ;;  %v671_v10 = vld [vmem:[#allocation2 + $0x50] sm:$0xff] }
 0x18d   : > { %1142 = vmatprep.subr.mxu0 %v679_v2  ;;  %1189 = vmatprep.subr.mxu1 %v679_v2  ;;  %v669_v6 = vld [vmem:[#allocation2 + $0x40] sm:$0xff]  ;;  %v664_v11 = vld [vmem:[#allocation2 + $0x18] sm:$0xff]  ;;  %v666_v15 = vld [vmem:[#allocation2 + $0x28] sm:$0xff] }
 0x18e   : > { %1143 = vmatpush3.msra.mxu0 %v679_v2  ;;  %1193 = vmatpush3.msra.mxu1 %v679_v2  ;;  %v672_v12 = vld [vmem:[#allocation2 + $0x58] sm:$0xff]  ;;  %v665_v13 = vld [vmem:[#allocation2 + $0x20] sm:$0xff]  ;;  %v674_v16 = vld [vmem:[#allocation2 + $0x68] sm:$0xff] }
 0x18f   : > { %1144 = vmatprep.subr.mxu0 %v678_v3  ;;  %1190 = vmatprep.subr.mxu1 %v678_v3  ;;  %v673_v14 = vld [vmem:[#allocation2 + $0x60] sm:$0xff]  ;;  %v667_v17 = vld [vmem:[#allocation2 + $0x30] sm:$0xff]  ;;  %v668_v19 = vld [vmem:[#allocation2 + $0x38] sm:$0xff] }
 0x190   : > { %1145 = vmatpush3.msra.mxu0 %v678_v3  ;;  %1194 = vmatpush3.msra.mxu1 %v678_v3  ;;  %v675_v18 = vld [vmem:[#allocation2 + $0x70] sm:$0xff]  ;;  %v676_v20 = vld [vmem:[#allocation2 + $0x78] sm:$0xff]  ;;  %v1048_v21 = vld [vmem:[%s1904_s5] ss:$0 sm:$0xff] }
 0x191   : > { %1146 = vmatprep.subr.mxu0 %v677_v4  ;;  %1191 = vmatprep.subr.mxu1 %v677_v4 }
 0x192   : > { %1147 = vmatpush3.msra.mxu0 %v677_v4  ;;  %1195 = vmatpush3.msra.mxu1 %v677_v4 }
 0x193   : > { %1148 = vmatprep.mubr.msk.f32.mxu0 %vm688_vm2, %v661_v5  ;;  %1160 = vmatprep.mubr.msk.f32.mxu1 %vm688_vm2, %v669_v6 }
 0x194   : > { %1149 = vmatmul.mubr.msk.f32.vlgmr.msra.gmra.mxu0 %vm688_vm2, %v662_v7  ;;  %1161 = vmatmul.mubr.msk.f32.vlgmr.msra.gmra.mxu1 %vm688_vm2, %v670_v8 }
 0x195   : > { %1151 = vmatprep.mubr.msk.f32.mxu0 %vm688_vm2, %v663_v9  ;;  %1163 = vmatprep.mubr.msk.f32.mxu1 %vm688_vm2, %v671_v10 }
 0x198   : > { %1152 = vmatmul.mubr.msk.f32.gmra.mxu0 %vm688_vm2, %v664_v11  ;;  %1164 = vmatmul.mubr.msk.f32.gmra.mxu1 %vm688_vm2, %v672_v12 }
 0x199   : > { %1154 = vmatprep.mubr.msk.f32.mxu0 %vm688_vm2, %v665_v13  ;;  %1166 = vmatprep.mubr.msk.f32.mxu1 %vm688_vm2, %v673_v14 }
 0x19c   : > { %1155 = vmatmul.mubr.msk.f32.gmra.mxu0 %vm688_vm2, %v666_v15  ;;  %1167 = vmatmul.mubr.msk.f32.gmra.mxu1 %vm688_vm2, %v674_v16 }
 0x19d   : > { %1157 = vmatprep.mubr.msk.f32.mxu0 %vm688_vm2, %v667_v17  ;;  %1169 = vmatprep.mubr.msk.f32.mxu1 %vm688_vm2, %v675_v18 }
 0x1a0   : > { %1158 = vmatmul.mubr.msk.f32.gmra.mxu0 %vm688_vm2, %v668_v19  ;;  %1170 = vmatmul.mubr.msk.f32.gmra.mxu1 %vm688_vm2, %v676_v20 }
 0x254   : > { %v1150_v22 = vpop.f32.mrf.mxu0  ;;  %v1162_v23 = vpop.f32.mrf.mxu1 }
 0x255   : > { %v809_v24 = vadd.f32 %v1150_v22, %v1048_v21  ;;  %v849_v25 = vadd.f32 %v1162_v23, %v1048_v21 }
 0x256   : > { %v803_v26 = vpop.f32.mrf.mxu0  ;;  %v843_v27 = vpop.f32.mrf.mxu1 }
 0x257   : > { %883 = vst [vmem:[%s1728_s29 + $0x8] sm:$0xff] %v809_v24  ;;  %891 = vst [vmem:[%s1728_s29 + $0x48] sm:$0xff] %v849_v25  ;;  %v804_v28 = vadd.f32 %v1048_v21, %v803_v26  ;;  %v844_v29 = vadd.f32 %v1048_v21, %v843_v27 }
 0x258   : > { %v1153_v30 = vpop.f32.mrf.mxu0  ;;  %v1165_v31 = vpop.f32.mrf.mxu1 }
 0x259   : > { %882 = vst [vmem:[%s1728_s29] sm:$0xff] %v804_v28  ;;  %890 = vst [vmem:[%s1728_s29 + $0x40] sm:$0xff] %v844_v29  ;;  %v819_v32 = vadd.f32 %v1153_v30, %v1048_v21  ;;  %v859_v33 = vadd.f32 %v1165_v31, %v1048_v21 }
 0x25a   : > { %v813_v34 = vpop.f32.mrf.mxu0  ;;  %v853_v35 = vpop.f32.mrf.mxu1 }
 0x25b   : > { %885 = vst [vmem:[%s1728_s29 + $0x18] sm:$0xff] %v819_v32  ;;  %893 = vst [vmem:[%s1728_s29 + $0x58] sm:$0xff] %v859_v33  ;;  %v814_v36 = vadd.f32 %v1048_v21, %v813_v34  ;;  %v854_v37 = vadd.f32 %v1048_v21, %v853_v35 }
 0x25c   : > { %v1156_v38 = vpop.f32.mrf.mxu0  ;;  %v1168_v39 = vpop.f32.mrf.mxu1 }
 0x25d   : > { %884 = vst [vmem:[%s1728_s29 + $0x10] sm:$0xff] %v814_v36  ;;  %892 = vst [vmem:[%s1728_s29 + $0x50] sm:$0xff] %v854_v37  ;;  %v829_v40 = vadd.f32 %v1156_v38, %v1048_v21  ;;  %v869_v41 = vadd.f32 %v1168_v39, %v1048_v21 }
 0x25e   : > { %v823_v42 = vpop.f32.mrf.mxu0  ;;  %v863_v43 = vpop.f32.mrf.mxu1 }
 0x25f   : > { %887 = vst [vmem:[%s1728_s29 + $0x28] sm:$0xff] %v829_v40  ;;  %895 = vst [vmem:[%s1728_s29 + $0x68] sm:$0xff] %v869_v41  ;;  %v824_v44 = vadd.f32 %v1048_v21, %v823_v42  ;;  %v864_v45 = vadd.f32 %v1048_v21, %v863_v43 }
 0x260   : > { %v1159_v46 = vpop.f32.mrf.mxu0  ;;  %v1171_v47 = vpop.f32.mrf.mxu1 }
 0x261   : > { %886 = vst [vmem:[%s1728_s29 + $0x20] sm:$0xff] %v824_v44  ;;  %894 = vst [vmem:[%s1728_s29 + $0x60] sm:$0xff] %v864_v45  ;;  %v839_v48 = vadd.f32 %v1159_v46, %v1048_v21  ;;  %v879_v49 = vadd.f32 %v1171_v47, %v1048_v21 }
 0x262   : > { %v833_v50 = vpop.f32.mrf.mxu0  ;;  %v873_v51 = vpop.f32.mrf.mxu1 }
 0x263   : > { %889 = vst [vmem:[%s1728_s29 + $0x38] sm:$0xff] %v839_v48  ;;  %897 = vst [vmem:[%s1728_s29 + $0x78] sm:$0xff] %v879_v49  ;;  %v834_v52 = vadd.f32 %v1048_v21, %v833_v50  ;;  %v874_v53 = vadd.f32 %v1048_v21, %v873_v51 }
 0x265   : > { %888 = vst [vmem:[%s1728_s29 + $0x30] sm:$0xff] %v834_v52  ;;  %896 = vst [vmem:[%s1728_s29 + $0x70] sm:$0xff] %v874_v53 }
 0x266 PF: > { %s1071_s24 = sshll.u32 %s1488_s12, 11  ;;  %s912_s0 = sshll.u32 %s1728_s29, 4  ;;  %s1836_s0 = int_to_ptr.vmem [resolvable:$true] %s912_s0 }
 0x267   : > { %s1833_s25 = scalar_lea.hbm %s1905_s6, %s1071_s24  ;;  %s1840_s10 = scalar_lea.sflag [#allocation8], %s321_s28 }
 0x268   : > { %s1378_s8 = scalar_lea.vmem %s1836_s0, 2048  ;;  %p1926_p9 = scmp.ne.s32.totalorder %s1919_s27, 0 }
 0x269   : > { %p1379_p8 = scmp.ne.s32.totalorder %s1836_s0, %s1378_s8  ;;  %s1509_s12 = smov [#allocation9]  }
 0x26a   : > { %s1382_s22 = sshll.u32 %s1509_s12, 4  ;;  %s1383_s22 = int_to_ptr.vmem [resolvable:$false] %s1382_s22 }
 0x26b   : > { %p1380_p11 = pnand %p1379_p8, %p1926_p9  ;;  %s1384_s21 = scalar_lea.vmem %s1383_s22, 4096 }
 0x26c   : > { %p1385_p2 = scmp.lt.s32.totalorder %s1836_s0, %s1383_s22  ;;  %p1386_p12 = scmp.lt.s32.totalorder %s1384_s21, %s1378_s8 }
 0x26d   : > { %p1381_p13 = pneg %p1380_p11 }
 0x26e   : > { %p1387_p3 = por %p1386_p12, %p1385_p2 }
 0x270   : > { %p1388_p7 = pnand %p1387_p3, %p1381_p13 }
 0x272   : > { %1391 = shalt.err (!%p1388_p7)
}
 0x273   : > { %s1392_s28 = scalar_lea.hbm %s1833_s25, 2048  ;;  %s1396_s13 = scalar_lea.hbm %s1905_s6, 8192 }
 0x274   : > { %p1393_p10 = scmp.ne.s32.totalorder %s1833_s25, %s1392_s28  ;;  %p1397_p1 = scmp.lt.s32.totalorder %s1833_s25, %s1905_s6 }
 0x275   : > { %p1398_p0 = scmp.lt.s32.totalorder %s1396_s13, %s1392_s28 }
 0x276   : > { %p1394_p4 = pnand %p1393_p10, %p1926_p9 }
 0x277   : > { %p1399_p5 = por %p1398_p0, %p1397_p1 }
 0x278   : > { %p1395_p6 = pneg %p1394_p4 }
 0x27a   : > { %p1400_p8 = pnand %p1399_p5, %p1395_p6 }
 0x27c   : > { %1403 = shalt.err (!%p1400_p8)
}
 0x27d   : > { %s1510_s23 = smov 128   ;;  %s1511_s18 = smov 8  }
 0x27e   : > { %1200 = dma.vmem_to_hbm [thread:$0]  (%p1926_p9), %s1836_s0, 2048, %s1833_s25, %s1840_s10, %s1510_s23, %s1510_s23, %s1511_s18  }
 0x27f PF: > { %p1213_p11 = scmp.ge.s32.totalorder %s1500_s15, 2  ;;  %s927_s24 = sand.u32 1, %s1460_s1  }
 0x280   : > { %p1927_p13 = scmp.ne.s32.totalorder %s1920_s20, 0  ;;  %s928_s26 = scalar_lea.sflag [#allocation8], %s927_s24 }
 0x282   : > { %p1209_p2 = pnand %p1213_p11, %p1927_p13 }
 0x284   : > { %p1210_p12 = pneg %p1209_p2 }
 0x286   : > { %1455 = dma.done.wait (%p1210_p12), %s928_s26, 2048  }
 0x287   : > { %1457 = vsyncadd (%p1210_p12), %s928_s26, 4294965248  ;;  %s32_s15 = sadd.s32 1, %s1500_s15   ;;  %s1928_s19 = sld [smem:[#allocation19_spill]] }
 0x288   : > { %p29_p3 = scmp.ge.s32.totalorder %s32_s15, 14   ;;  %s1929_s27 = sld [smem:[#allocation15_spill]] }
 0x289   : > { %s1930_s10 = sld [smem:[#allocation20_spill]]  ;;  %s1934_s1 = smov %s1464_s30 }
 0x28a   : > { %s1931_s11 = sld [smem:[#allocation16_spill]]  ;;  %s1935_s30 = smov %s1468_s7 }
 0x28b   : > { %s1932_s13 = sld [smem:[#allocation17_spill]]  ;;  %s1937_s8 = smov %s1476_s9 }
 0x28c   : > { %s1933_s25 = sld [smem:[#allocation18_spill]]  ;;  %s1939_s12 = smov %s1496_s14 }
 0x28d   : > { %s1936_s7 = smov %s1928_s19 }
 0x28e   : > { %s1938_s9 = smov %s1929_s27  ;;  %31 = sbr.rel (!%p29_p3) target bundleno = 34 (0x22), region = 96 }
 0x292   : > { %s1940_s14 = smov %s1933_s25 }
 0x293   :  { %933 = vsyncpa [#allocation7], 1 }
 0x294   :  { %935 = vsyncpa [#allocation7 + $0x1], 1 }
 0x295   :  { %936 = vsyncpa [#allocation8], 1 }
 0x296   :  { %938 = vsyncpa [#allocation8 + $0x1], 1 }

</bundles_post_ra>
